<compile_context>
chip_gen: v6e
topology: v6e:2x2x1
jax: 0.10.0
libtpu: 0.0.40
codegen_flags: <defaults>
</compile_context>

<pallas_src>
import functools

import jax
import jax.numpy as jnp
from jax.experimental import pallas as pl
from jax.experimental.pallas import tpu as pltpu

# "config" values (synthetic, deterministic — no checkpoint / vocab file load)
VOCAB_SIZE = 50          # Vocab(config).vocab_size()
PAD_IDX = 0              # Vocab(config).pad_token_idx()  -> zero embedding row
EMBED_DIM = 32           # config['text_embedding']['embedding_dim']
MAX_LEN = 8              # config['text_embedding']['max_length']
DROPOUT_P = 0.1          # config['text_embedding']['dropout']


def _embed_dropout_kernel(ids_ref, table_ref, unif_ref, out_ref, *,
                          dropout_p, apply_dropout):
    """One grid step = one block of T tokens.

    ids_ref   : (T, 1)    int32   token ids for this block
    table_ref : (Vpad, D) float32 full embedding table (VMEM-resident)
    unif_ref  : (T, D)    float32 uniform randoms in [0, 1) for dropout
    out_ref   : (T, D)    float32 embedded (and dropped-out) tokens
    """
    ids = ids_ref[...]                     # (T, 1) int32
    table = table_ref[...]                 # (Vpad, D) f32
    t = ids.shape[0]
    vpad = table.shape[0]

    # In-kernel gather as a one-hot matmul on the MXU:
    #   onehot (T, Vpad) @ table (Vpad, D) -> rows (T, D).
    # Exact at HIGHEST precision because the one-hot operand is exactly 0/1;
    # ids outside [0, Vpad) simply produce an all-zero row (no OOB access).
    vocab_iota = jax.lax.broadcasted_iota(jnp.int32, (t, vpad), 1)
    onehot = (vocab_iota == ids).astype(jnp.float32)
    rows = jnp.dot(onehot, table,
                   preferred_element_type=jnp.float32,
                   precision=jax.lax.Precision.HIGHEST)

    if apply_dropout:
        # Inverted dropout: keep with prob (1 - p), scale kept values by 1/(1-p).
        keep = unif_ref[...] < jnp.float32(1.0 - dropout_p)
        scale = jnp.float32(1.0 / (1.0 - dropout_p))
        rows = jnp.where(keep, rows * scale, jnp.zeros_like(rows))

    out_ref[...] = rows.astype(out_ref.dtype)


def word_embedding_forward(input_ids, emb_table, *, dropout_p=DROPOUT_P,
                           rng_key=None, train=True, block_tokens=256):
    """input_ids: (B, L) int32; emb_table: (V, D) float32 -> (B, L, D) float32."""
    B, L = input_ids.shape
    V, D = emb_table.shape
    n = B * L

    # Pad the vocab dimension up to a multiple of 128 with zero rows: keeps the
    # in-kernel one-hot contraction tile-aligned and maps invalid ids to zeros.
    v_pad = ((V + 127) // 128) * 128
    table_padded = jnp.zeros((v_pad, D), dtype=jnp.float32)
    table_padded = table_padded.at[:V, :].set(emb_table.astype(jnp.float32))

    ids2d = input_ids.reshape(n, 1).astype(jnp.int32)

    apply_dropout = bool(train) and float(dropout_p) > 0.0
    if apply_dropout:
        if rng_key is None:
            rng_key = jax.random.PRNGKey(0)
        unif = jax.random.uniform(rng_key, (n, D), dtype=jnp.float32)
    else:
        unif = jnp.zeros((n, D), dtype=jnp.float32)   # unused (static branch off)

    # Tokens per grid step: one step for small inputs, 256-token blocks otherwise.
    T = n if n <= block_tokens else block_tokens
    grid = (pl.cdiv(n, T),)

    kernel = functools.partial(_embed_dropout_kernel,
                               dropout_p=float(dropout_p),
                               apply_dropout=apply_dropout)

    out_flat = pl.pallas_call(
        kernel,
        out_shape=jax.ShapeDtypeStruct((n, D), jnp.float32),
        grid_spec=pltpu.PrefetchScalarGridSpec(
            num_scalar_prefetch=0,
            grid=grid,
            in_specs=[
                pl.BlockSpec((T, 1), lambda i: (i, 0)),       # token ids block
                pl.BlockSpec((v_pad, D), lambda i: (0, 0)),   # table, VMEM-resident
                pl.BlockSpec((T, D), lambda i: (i, 0)),       # dropout uniforms
            ],
            out_specs=pl.BlockSpec((T, D), lambda i: (i, 0)),
        ),
        compiler_params=pltpu.CompilerParams(
            dimension_semantics=("parallel",)),
    )(ids2d, table_padded, unif)

    return out_flat.reshape(B, L, D)


if __name__ == "__main__":
    key = jax.random.PRNGKey(0)
    k_emb, k_ids, k_drop = jax.random.split(key, 3)

    # nn.Embedding(vocab_size, embedding_dim, padding_idx): pad row is zeroed.
    emb_table = jax.random.normal(k_emb, (VOCAB_SIZE, EMBED_DIM), dtype=jnp.float32)
    emb_table = emb_table.at[PAD_IDX].set(0.0)

    B = 2
    input_texts = jax.random.randint(k_ids, (B, MAX_LEN), 0, VOCAB_SIZE,
                                     dtype=jnp.int32)

    # Train mode (dropout active), matching the PyTorch module's default state.
    out = word_embedding_forward(input_texts, emb_table, dropout_p=DROPOUT_P,
                                 rng_key=k_drop, train=True)
    jax.block_until_ready(out)
    assert out.shape == (B, MAX_LEN, EMBED_DIM)
    assert out.dtype == jnp.float32

    # Eval mode (dropout = no-op) must match a plain embedding lookup.
    out_eval = word_embedding_forward(input_texts, emb_table,
                                      dropout_p=DROPOUT_P, train=False)
    ref = emb_table[input_texts]
    assert jnp.allclose(out_eval, ref, atol=1e-4, rtol=1e-4)

    print("KERNEL_OK")
</pallas_src>

<mosaic_0001>
module attributes {stable_mosaic.version = 11 : i64} {
  func.func @_embed_dropout_kernel(%arg0: i32, %arg1: memref<16x1xi32, #tpu.memory_space<vmem>>, %arg2: memref<128x32xf32, #tpu.memory_space<vmem>>, %arg3: memref<16x32xf32, #tpu.memory_space<vmem>>, %arg4: memref<16x32xf32, #tpu.memory_space<vmem>>) attributes {dimension_semantics = [#tpu.dimension_semantics<parallel>], iteration_bounds = array<i64: 1>, scalar_prefetch = 0 : i64, scratch_operands = 0 : i64, tpu.core_type = #tpu.core_type<tc>, window_params = [{transform_indices = @transform_0, window_bounds = array<i64: 16, 1>}, {pipeline_mode = #tpu.pipeline_mode<synchronous>, transform_indices = @transform_1, window_bounds = array<i64: 128, 32>}, {transform_indices = @transform_2, window_bounds = array<i64: 16, 32>}, {transform_indices = @transform_3, window_bounds = array<i64: 16, 32>}]} {
    %c0 = arith.constant 0 : index
    %c0_0 = arith.constant 0 : index
    %0 = vector.load %arg1[%c0, %c0_0] : memref<16x1xi32, #tpu.memory_space<vmem>>, vector<16x1xi32>
    %c0_1 = arith.constant 0 : index
    %c0_2 = arith.constant 0 : index
    %1 = vector.load %arg2[%c0_1, %c0_2] : memref<128x32xf32, #tpu.memory_space<vmem>>, vector<128x32xf32>
    %2 = tpu.iota {dimensions = array<i32: 1>} : vector<16x128xi32>
    %3 = vector.broadcast %0 : vector<16x1xi32> to vector<16x128xi32>
    %4 = arith.cmpi eq, %2, %3 : vector<16x128xi32>
    %5 = arith.extui %4 : vector<16x128xi1> to vector<16x128xi32>
    %6 = arith.sitofp %5 : vector<16x128xi32> to vector<16x128xf32>
    %cst = arith.constant dense<0.000000e+00> : vector<16x32xf32>
    %7 = tpu.matmul %6, %1, %cst {dimension_numbers = #tpu.dot_dimension_numbers<[1], [0], [0], [1], [0, 0, 1, 1], [], []>, precision = #tpu.contract_precision<fp32>} : vector<16x128xf32>, vector<128x32xf32>, vector<16x32xf32> -> vector<16x32xf32>
    %c0_3 = arith.constant 0 : index
    %c0_4 = arith.constant 0 : index
    %8 = vector.load %arg3[%c0_3, %c0_4] : memref<16x32xf32, #tpu.memory_space<vmem>>, vector<16x32xf32>
    %cst_5 = arith.constant 0.899999976 : f32
    %9 = vector.broadcast %cst_5 : f32 to vector<16x32xf32>
    %10 = arith.cmpf olt, %8, %9 : vector<16x32xf32>
    %cst_6 = arith.constant 1.11111116 : f32
    %11 = vector.broadcast %cst_6 : f32 to vector<16x32xf32>
    %12 = arith.mulf %7, %11 : vector<16x32xf32>
    %cst_7 = arith.constant 0.000000e+00 : f32
    %13 = vector.broadcast %cst_7 : f32 to vector<16x32xf32>
    %14 = arith.select %10, %12, %13 : vector<16x32xi1>, vector<16x32xf32>
    %c0_8 = arith.constant 0 : index
    %c0_9 = arith.constant 0 : index
    %15 = vector.load %arg4[%c0_8, %c0_9] : memref<16x32xf32, #tpu.memory_space<vmem>>, vector<16x32xf32>
    tpu.vector_store %arg4[%c0_8, %c0_9], %14 {strides = array<i32>} : memref<16x32xf32, #tpu.memory_space<vmem>>, vector<16x32xf32>,
    return
  }
  func.func @transform_0(%arg0: i32) -> (i32, i32) {
    %c0_i32 = arith.constant 0 : i32
    %c0_i32_0 = arith.constant 0 : i32
    return %arg0, %c0_i32 : i32, i32
  }
  func.func @transform_1(%arg0: i32) -> (i32, i32) {
    %c0_i32 = arith.constant 0 : i32
    %c0_i32_0 = arith.constant 0 : i32
    %c0_i32_1 = arith.constant 0 : i32
    return %c0_i32, %c0_i32_0 : i32, i32
  }
  func.func @transform_2(%arg0: i32) -> (i32, i32) {
    %c0_i32 = arith.constant 0 : i32
    %c0_i32_0 = arith.constant 0 : i32
    return %arg0, %c0_i32 : i32, i32
  }
  func.func @transform_3(%arg0: i32) -> (i32, i32) {
    %c0_i32 = arith.constant 0 : i32
    %c0_i32_0 = arith.constant 0 : i32
    return %arg0, %c0_i32 : i32, i32
  }
}

</mosaic_0001>

<bundles_post_ra>
// kernel: tpu_custom_call.1
= control target key start
LH: loop header
LB: loop body
LE: loop exit
PB: predicated region body
PF: predicated region fallthrough
CT: control target
= control target key end

     0   :  { %v1113_v2 = vmov 0   ;;  %s1567_s0 = inlined_call_operand.vmem [shape: s32[16,1], index: 0, kind: input, shape index: {}]   ;;  %s1568_s1 = inlined_call_operand.vmem [shape: f32[128,32], index: 1, kind: input, shape index: {}]   ;;  %s1569_s2 = inlined_call_operand.vmem [shape: f32[16,32], index: 2, kind: input, shape index: {}]   ;;  %s1570_s3 = inlined_call_operand.hbm [shape: f32[16,32], index: 3, kind: output, shape index: {}]  }
   0x1   :  { %v15_v0 = vld [vmem:[%s1567_s0] sm:$0xff]  ;;  %v32_v1 = vld [vmem:[%s1568_s1 + $0x78] sm:$0xff]  ;;  %1090 = vset.pattern.permute.xlu0 %v1113_v2  ;;  %v31_v4 = vld [vmem:[%s1568_s1 + $0x70] sm:$0xff] }
   0x2   :  { %v1145_v3 = vand.u32 4294901760, %v32_v1  ;;  %v30_v5 = vld [vmem:[%s1568_s1 + $0x68] sm:$0xff]  ;;  %v29_v6 = vld [vmem:[%s1568_s1 + $0x60] sm:$0xff]  ;;  %36 = vperm.xlu0 %1090, %v15_v0   ;;  %v1156_v7 = vand.u32 4294901760, %v31_v4  ;;  %v28_v10 = vld [vmem:[%s1568_s1 + $0x58] sm:$0xff] }
   0x3   :  { %v1158_v8 = vand.u32 4294901760, %v30_v5  ;;  %v1160_v9 = vand.u32 4294901760, %v29_v6  ;;  %v27_v11 = vld [vmem:[%s1568_s1 + $0x50] sm:$0xff]  ;;  %v26_v12 = vld [vmem:[%s1568_s1 + $0x48] sm:$0xff]  ;;  %v1177_v15 = vand.u32 4294901760, %v28_v10  ;;  %v25_v18 = vld [vmem:[%s1568_s1 + $0x40] sm:$0xff] }
   0x4   :  { %v16_v13 = vld [vmem:[%s1567_s0 + $0x8] sm:$0xff]  ;;  %v1175_v14 = vsub.f32 %v32_v1, %v1145_v3  ;;  %874 = vmatprep.subr.mxu0 %v1145_v3  ;;  %v1180_v16 = vand.u32 4294901760, %v27_v11  ;;  %v1182_v17 = vand.u32 4294901760, %v26_v12  ;;  %v1188_v19 = vsub.f32 %v31_v4, %v1156_v7 }
   0x5   :  { %v1191_v20 = vsub.f32 %v30_v5, %v1158_v8  ;;  %v1194_v21 = vsub.f32 %v29_v6, %v1160_v9  ;;  %875 = vmatpush3.msra.mxu0 %v1145_v3  ;;  %v1197_v22 = vand.u32 4294901760, %v25_v18  ;;  %v1203_v24 = vsub.f32 %v28_v10, %v1177_v15 }
   0x6   :  { %v1200_v23 = vand.u32 4294901760, %v1175_v14  ;;  %v1206_v25 = vsub.f32 %v27_v11, %v1180_v16  ;;  %876 = vmatprep.subr.mxu0 %v1156_v7  ;;  %39 = vperm.xlu0 %1090, %v16_v13   ;;  %v1210_v26 = vand.u32 4294901760, %v1188_v19  ;;  %v1220_v29 = vsub.f32 %v26_v12, %v1182_v17 }
   0x7   :  { %v1213_v27 = vand.u32 4294901760, %v1191_v20  ;;  %v1216_v28 = vand.u32 4294901760, %v1194_v21  ;;  %877 = vmatpush3.msra.mxu0 %v1156_v7 }
   0x8   :  { %8 = vsyncpa [#allocation3], 0  ;;  %v152_v30 = vsub.f32 %v1175_v14, %v1200_v23  ;;  %v1225_v31 = vand.u32 4294901760, %v1203_v24  ;;  %878 = vmatprep.subr.mxu0 %v1158_v8  ;;  %v159_v32 = vsub.f32 %v1188_v19, %v1210_v26  ;;  %v1234_v34 = vsub.f32 %v25_v18, %v1197_v22  ;;  %v24_v35 = vld [vmem:[%s1568_s1 + $0x38] sm:$0xff]  ;;  %v23_v39 = vld [vmem:[%s1568_s1 + $0x30] sm:$0xff]  ;;  %s1116_s23 = smov [#allocation2]  }
   0x9   :  { %v166_v33 = vsub.f32 %v1191_v20, %v1213_v27  ;;  %879 = vmatpush3.msra.mxu0 %v1158_v8  ;;  %v173_v37 = vsub.f32 %v1194_v21, %v1216_v28  ;;  %v1242_v38 = vand.u32 4294901760, %v1206_v25  ;;  %v22_v40 = vld [vmem:[%s1568_s1 + $0x28] sm:$0xff]  ;;  %v1252_v42 = vand.u32 4294901760, %v1220_v29  ;;  %v21_v43 = vld [vmem:[%s1568_s1 + $0x20] sm:$0xff]  ;;  %v20_v50 = vld [vmem:[%s1568_s1 + $0x18] sm:$0xff]  ;;  %s747_s24 = sshll.u32 %s1116_s23, 4  ;;  %s748_s24 = int_to_ptr.vmem [resolvable:$true] %s747_s24 }
   0xa   :  { %v153_v36 = vand.u32 4294901760, %v152_v30  ;;  %880 = vmatprep.subr.mxu0 %v1160_v9  ;;  %v160_v41 = vand.u32 4294901760, %v159_v32  ;;  %v180_v45 = vsub.f32 %v1203_v24, %v1225_v31  ;;  %v1260_v46 = vand.u32 4294901760, %v24_v35  ;;  %v19_v57 = vld [vmem:[%s1568_s1 + $0x10] sm:$0xff]  ;;  %v18_v63 = vld [vmem:[%s1568_s1 + $0x8] sm:$0xff]  ;;  %v17_v6 = vld [vmem:[%s1568_s1] sm:$0xff]  ;;  %p1096_p1 = scmp.lt.s32.totalorder %s748_s24, %s748_s24 }
   0xb   :  { %881 = vmatpush3.msra.mxu0 %v1160_v9  ;;  %v167_v44 = vand.u32 4294901760, %v166_v33  ;;  %v1264_v47 = vand.u32 4294901760, %v1234_v34  ;;  %v1267_v48 = vand.u32 4294901760, %v23_v39  ;;  %v1269_v49 = vand.u32 4294901760, %v22_v40  ;;  %s1091_s25 = scalar_lea.vmem %s748_s24, 256 }
   0xc   :  { %909 = vmatprep.subr.mxu1 %v153_v36  ;;  %882 = vmatprep.subr.mxu0 %v1177_v15  ;;  %v174_v51 = vand.u32 4294901760, %v173_v37  ;;  %v187_v52 = vsub.f32 %v1206_v25, %v1242_v38  ;;  %v1277_v53 = vsub.f32 %v24_v35, %v1260_v46  ;;  %v1280_v54 = vand.u32 4294901760, %v21_v43  ;;  %p1092_p0 = scmp.ne.s32.totalorder %s748_s24, %s1091_s25  ;;  %p1097_p2 = scmp.lt.s32.totalorder %s1091_s25, %s1091_s25 }
   0xd   :  { %910 = vmatpush3.msra.mxu1 %v153_v36  ;;  %883 = vmatpush3.msra.mxu0 %v1177_v15  ;;  %v194_v55 = vsub.f32 %v1220_v29, %v1252_v42  ;;  %v1285_v56 = vsub.f32 %v23_v39, %v1267_v48  ;;  %v181_v58 = vand.u32 4294901760, %v180_v45  ;;  %v1295_v60 = vsub.f32 %v22_v40, %v1269_v49 }
   0xe   :  { %911 = vmatprep.subr.mxu1 %v160_v41  ;;  %884 = vmatprep.subr.mxu0 %v1180_v16  ;;  %v1292_v59 = vand.u32 4294901760, %v1277_v53  ;;  %v1298_v61 = vand.u32 4294901760, %v20_v50  ;;  %v201_v62 = vsub.f32 %v1234_v34, %v1264_v47  ;;  %v188_v0 = vand.u32 4294901760, %v187_v52  ;;  %p1098_p3 = por %p1097_p2, %p1096_p1 }
   0xf   :  { %912 = vmatpush3.msra.mxu1 %v160_v41  ;;  %885 = vmatpush3.msra.mxu0 %v1180_v16  ;;  %v1307_v1 = vand.u32 4294901760, %v1285_v56  ;;  %v1310_v2 = vsub.f32 %v21_v43, %v1280_v54  ;;  %v1313_v4 = vand.u32 4294901760, %v19_v57  ;;  %v195_v5 = vand.u32 4294901760, %v194_v55 }
  0x10   :  { %913 = vmatprep.subr.mxu1 %v167_v44  ;;  %886 = vmatprep.subr.mxu0 %v1182_v17  ;;  %v208_v10 = vsub.f32 %v1277_v53, %v1292_v59  ;;  %v1322_v11 = vand.u32 4294901760, %v1295_v60  ;;  %v1325_v12 = vsub.f32 %v20_v50, %v1298_v61  ;;  %v1328_v13 = vand.u32 4294901760, %v18_v63  ;;  %p1099_p4 = pnand %p1098_p3, %p1092_p0 }
  0x11   :  { %914 = vmatpush3.msra.mxu1 %v167_v44  ;;  %887 = vmatpush3.msra.mxu0 %v1182_v17  ;;  %v202_v18 = vand.u32 4294901760, %v201_v62  ;;  %v215_v30 = vsub.f32 %v1285_v56, %v1307_v1  ;;  %v1334_v32 = vand.u32 4294901760, %v1310_v2  ;;  %v1337_v33 = vsub.f32 %v19_v57, %v1313_v4 }
  0x12   :  { %915 = vmatprep.subr.mxu1 %v174_v51  ;;  %888 = vmatprep.subr.mxu0 %v1197_v22  ;;  %v1340_v35 = vand.u32 4294901760, %v17_v6  ;;  %v209_v36 = vand.u32 4294901760, %v208_v10  ;;  %v222_v37 = vsub.f32 %v1295_v60, %v1322_v11  ;;  %v1346_v39 = vand.u32 4294901760, %v1325_v12 }
  0x13   :  { %916 = vmatpush3.msra.mxu1 %v174_v51  ;;  %889 = vmatpush3.msra.mxu0 %v1197_v22  ;;  %v1349_v40 = vsub.f32 %v18_v63, %v1328_v13  ;;  %v216_v41 = vand.u32 4294901760, %v215_v30  ;;  %v229_v43 = vsub.f32 %v1310_v2, %v1334_v32  ;;  %v1356_v44 = vand.u32 4294901760, %v1337_v33 }
  0x14   :  { %917 = vmatprep.subr.mxu1 %v181_v58  ;;  %890 = vmatprep.subr.mxu0 %v1260_v46  ;;  %v1359_v45 = vsub.f32 %v17_v6, %v1340_v35  ;;  %v223_v50 = vand.u32 4294901760, %v222_v37  ;;  %v236_v51 = vsub.f32 %v1325_v12, %v1346_v39  ;;  %v1114_v37 = vmov 0.0  }
  0x15   :  { %918 = vmatpush3.msra.mxu1 %v181_v58  ;;  %891 = vmatpush3.msra.mxu0 %v1260_v46  ;;  %v1366_v52 = vand.u32 4294901760, %v1349_v40  ;;  %v230_v55 = vand.u32 4294901760, %v229_v43  ;;  %v243_v57 = vsub.f32 %v1337_v33, %v1356_v44  ;;  %v1115_v43 = vmov 1.0  }
  0x16   :  { %919 = vmatprep.subr.mxu1 %v188_v0  ;;  %892 = vmatprep.subr.mxu0 %v1267_v48  ;;  %v1373_v58 = vand.u32 4294901760, %v1359_v45  ;;  %v237_v62 = vand.u32 4294901760, %v236_v51  ;;  %vm739_vm3 = vcmask 261120  }
  0x17   :  { %920 = vmatpush3.msra.mxu1 %v188_v0  ;;  %893 = vmatpush3.msra.mxu0 %v1267_v48  ;;  %v250_v63 = vsub.f32 %v1349_v40, %v1366_v52  ;;  %v244_v0 = vand.u32 4294901760, %v243_v57 }
  0x18   :  { %921 = vmatprep.subr.mxu1 %v195_v5  ;;  %894 = vmatprep.subr.mxu0 %v1269_v49 }
  0x19   :  { %922 = vmatpush3.msra.mxu1 %v195_v5  ;;  %895 = vmatpush3.msra.mxu0 %v1269_v49  ;;  %v257_v5 = vsub.f32 %v1359_v45, %v1373_v58  ;;  %v251_v6 = vand.u32 4294901760, %v250_v63 }
  0x1a   :  { %923 = vmatprep.subr.mxu1 %v202_v18  ;;  %896 = vmatprep.subr.mxu0 %v1280_v54 }
  0x1b   :  { %924 = vmatpush3.msra.mxu1 %v202_v18  ;;  %897 = vmatpush3.msra.mxu0 %v1280_v54  ;;  %v258_v10 = vand.u32 4294901760, %v257_v5  ;;  %v33_v18 = vlaneseq }
  0x1c   :  { %925 = vmatprep.subr.mxu1 %v209_v36  ;;  %898 = vmatprep.subr.mxu0 %v1298_v61 }
  0x1d   :  { %926 = vmatpush3.msra.mxu1 %v209_v36  ;;  %899 = vmatpush3.msra.mxu0 %v1298_v61  ;;  %v1387_v30 = vand.u32 127, %v33_v18 }
  0x1e   :  { %927 = vmatprep.subr.mxu1 %v216_v41  ;;  %900 = vmatprep.subr.mxu0 %v1313_v4 }
  0x1f   :  { %928 = vmatpush3.msra.mxu1 %v216_v41  ;;  %901 = vmatpush3.msra.mxu0 %v1313_v4 }
  0x20   :  { %929 = vmatprep.subr.mxu1 %v223_v50  ;;  %902 = vmatprep.subr.mxu0 %v1328_v13 }
  0x21   :  { %930 = vmatpush3.msra.mxu1 %v223_v50  ;;  %903 = vmatpush3.msra.mxu0 %v1328_v13 }
  0x22   :  { %931 = vmatprep.subr.mxu1 %v230_v55  ;;  %904 = vmatprep.subr.mxu0 %v1340_v35 }
  0x23   :  { %932 = vmatpush3.msra.mxu1 %v230_v55  ;;  %905 = vmatpush3.msra.mxu0 %v1340_v35 }
  0x24   :  { %933 = vmatprep.subr.mxu1 %v237_v62  ;;  %944 = vmatprep.subr.mxu0 %v1175_v14 }
  0x25   :  { %934 = vmatpush3.msra.mxu1 %v237_v62 }
  0x26   :  { %935 = vmatprep.subr.mxu1 %v244_v0 }
  0x27   :  { %936 = vmatpush3.msra.mxu1 %v244_v0 }
  0x28   :  { %937 = vmatprep.subr.mxu1 %v251_v6 }
  0x29   :  { %938 = vmatpush3.msra.mxu1 %v251_v6 }
  0x2a   :  { %939 = vmatprep.subr.mxu1 %v258_v10 }
  0x2b   :  { %940 = vmatpush3.msra.mxu1 %v258_v10 }
  0x2c   :  { %979 = vmatprep.subr.mxu1 %v1145_v3 }
  0x7d   :  { %v1389_v36 = vpop.permute.xlu0 %36 }
  0x7e   :  { %vm41_vm0 = vcmp.eq.s32.totalorder %v1387_v30, %v1389_v36 }
  0x7f   :  { %v758_v41 = vsel %vm41_vm0, 1.0, %v1114_v37  ;;  %941 = vmatprep.mubr.msk.f32.mxu1 %vm41_vm0, %v1115_v43 }
  0x80   :  { %v129_v50 = vsub.f32 %v758_v41, %v758_v41 }
  0x81   :  { %v1400_v51 = vpop.permute.xlu0 %39 }
  0x82   :  { %vm42_vm1 = vcmp.eq.s32.totalorder %v1387_v30, %v1400_v51  ;;  %v130_v55 = vand.u32 4294901760, %v129_v50 }
  0x83   :  { %v759_v57 = vsel %vm42_vm1, 1.0, %v1114_v37  ;;  %942 = vmatmul.mubr.msk.f32.vlgmr.msra.gmra.mxu1 %vm42_vm1, %v1115_v43 }
  0x84   :  { %v1411_v62 = vsub.f32 %v759_v57, %v759_v57  ;;  %980 = vmatpush3.msra.mxu1 %v1145_v3  ;;  %1011 = vmatprep.mubr.f32.mxu1 %v130_v55  ;;  %v131_v63 = vsub.f32 %v129_v50, %v130_v55 }
  0x85   :  { %981 = vmatprep.subr.mxu1 %v1156_v7 }
  0x86   :  { %982 = vmatpush3.msra.mxu1 %v1156_v7  ;;  %v132_v0 = vand.u32 4294901760, %v131_v63  ;;  %v140_v5 = vand.u32 4294901760, %v1411_v62 }
  0x87   :  { %983 = vmatprep.subr.mxu1 %v1158_v8 }
  0x88   :  { %984 = vmatpush3.msra.mxu1 %v1158_v8  ;;  %906 = vmatprep.mubr.f32.mxu0 %v132_v0  ;;  %v141_v6 = vsub.f32 %v1411_v62, %v140_v5 }
  0x89   :  { %985 = vmatprep.subr.mxu1 %v1160_v9 }
  0x8a   :  { %986 = vmatpush3.msra.mxu1 %v1160_v9  ;;  %v142_v10 = vand.u32 4294901760, %v141_v6 }
  0x8b   :  { %987 = vmatprep.subr.mxu1 %v1177_v15 }
  0x8c   :  { %988 = vmatpush3.msra.mxu1 %v1177_v15  ;;  %907 = vmatmul.mubr.f32.vlgmr.msra.gmra.mxu0 %v142_v10 }
  0x8d   :  { %945 = vmatpush3.msra.mxu0 %v1175_v14  ;;  %989 = vmatprep.subr.mxu1 %v1180_v16 }
  0x8e   :  { %946 = vmatprep.subr.mxu0 %v1188_v19  ;;  %976 = vmatprep.mubr.f32.mxu0 %v129_v50 }
  0x8f   :  { %990 = vmatpush3.msra.mxu1 %v1180_v16  ;;  %947 = vmatpush3.msra.mxu0 %v1188_v19 }
  0x90   :  { %991 = vmatprep.subr.mxu1 %v1182_v17  ;;  %948 = vmatprep.subr.mxu0 %v1191_v20 }
  0x91   :  { %992 = vmatpush3.msra.mxu1 %v1182_v17  ;;  %949 = vmatpush3.msra.mxu0 %v1191_v20 }
  0x92   :  { %993 = vmatprep.subr.mxu1 %v1197_v22  ;;  %950 = vmatprep.subr.mxu0 %v1194_v21 }
  0x93   :  { %994 = vmatpush3.msra.mxu1 %v1197_v22  ;;  %951 = vmatpush3.msra.mxu0 %v1194_v21 }
  0x94   :  { %995 = vmatprep.subr.mxu1 %v1260_v46  ;;  %952 = vmatprep.subr.mxu0 %v1203_v24 }
  0x95   :  { %996 = vmatpush3.msra.mxu1 %v1260_v46  ;;  %953 = vmatpush3.msra.mxu0 %v1203_v24 }
  0x96   :  { %997 = vmatprep.subr.mxu1 %v1267_v48  ;;  %954 = vmatprep.subr.mxu0 %v1206_v25 }
  0x97   :  { %998 = vmatpush3.msra.mxu1 %v1267_v48  ;;  %955 = vmatpush3.msra.mxu0 %v1206_v25 }
  0x98   :  { %999 = vmatprep.subr.mxu1 %v1269_v49  ;;  %956 = vmatprep.subr.mxu0 %v1220_v29 }
  0x99   :  { %1000 = vmatpush3.msra.mxu1 %v1269_v49  ;;  %957 = vmatpush3.msra.mxu0 %v1220_v29 }
  0x9a   :  { %1001 = vmatprep.subr.mxu1 %v1280_v54  ;;  %958 = vmatprep.subr.mxu0 %v1234_v34 }
  0x9b   :  { %1002 = vmatpush3.msra.mxu1 %v1280_v54  ;;  %959 = vmatpush3.msra.mxu0 %v1234_v34 }
  0x9c   :  { %1003 = vmatprep.subr.mxu1 %v1298_v61  ;;  %960 = vmatprep.subr.mxu0 %v1277_v53 }
  0x9d   :  { %1004 = vmatpush3.msra.mxu1 %v1298_v61  ;;  %961 = vmatpush3.msra.mxu0 %v1277_v53 }
  0x9e   :  { %1005 = vmatprep.subr.mxu1 %v1313_v4  ;;  %962 = vmatprep.subr.mxu0 %v1285_v56 }
  0x9f   :  { %1006 = vmatpush3.msra.mxu1 %v1313_v4  ;;  %963 = vmatpush3.msra.mxu0 %v1285_v56 }
  0xa0   :  { %1007 = vmatprep.subr.mxu1 %v1328_v13  ;;  %964 = vmatprep.subr.mxu0 %v1295_v60 }
  0xa1   :  { %1008 = vmatpush3.msra.mxu1 %v1328_v13  ;;  %965 = vmatpush3.msra.mxu0 %v1295_v60 }
  0xa2   :  { %1009 = vmatprep.subr.mxu1 %v1340_v35  ;;  %966 = vmatprep.subr.mxu0 %v1310_v2 }
  0xa3   :  { %1010 = vmatpush3.msra.mxu1 %v1340_v35  ;;  %967 = vmatpush3.msra.mxu0 %v1310_v2 }
  0xa4   :  { %1012 = vmatmul.mubr.f32.vlgmr.msra.gmra.mxu1 %v140_v5  ;;  %1049 = vmatprep.subr.mxu1 %v1145_v3 }
  0xa5   :  { %968 = vmatprep.subr.mxu0 %v1325_v12  ;;  %1050 = vmatpush3.msra.mxu1 %v1145_v3 }
  0xa6   :  { %1081 = vmatprep.mubr.msk.f32.mxu1 %vm41_vm0, %v1115_v43  ;;  %969 = vmatpush3.msra.mxu0 %v1325_v12 }
  0xa7   :  { %1051 = vmatprep.subr.mxu1 %v1156_v7  ;;  %970 = vmatprep.subr.mxu0 %v1337_v33 }
  0xa8   :  { %1052 = vmatpush3.msra.mxu1 %v1156_v7  ;;  %971 = vmatpush3.msra.mxu0 %v1337_v33 }
  0xa9   :  { %1053 = vmatprep.subr.mxu1 %v1158_v8  ;;  %972 = vmatprep.subr.mxu0 %v1349_v40 }
  0xaa   :  { %1054 = vmatpush3.msra.mxu1 %v1158_v8  ;;  %973 = vmatpush3.msra.mxu0 %v1349_v40 }
  0xab   :  { %1055 = vmatprep.subr.mxu1 %v1160_v9  ;;  %974 = vmatprep.subr.mxu0 %v1359_v45 }
  0xac   :  { %1056 = vmatpush3.msra.mxu1 %v1160_v9  ;;  %975 = vmatpush3.msra.mxu0 %v1359_v45 }
  0xad   :  { %1057 = vmatprep.subr.mxu1 %v1177_v15  ;;  %977 = vmatmul.mubr.f32.vlgmr.msra.gmra.mxu0 %v1411_v62 }
  0xae   :  { %1014 = vmatprep.subr.mxu0 %v1200_v23  ;;  %1058 = vmatpush3.msra.mxu1 %v1177_v15 }
  0xaf   :  { %1015 = vmatpush3.msra.mxu0 %v1200_v23  ;;  %1046 = vmatprep.mubr.msk.f32.mxu0 %vm41_vm0, %v1115_v43 }
  0xb0   :  { %1059 = vmatprep.subr.mxu1 %v1180_v16  ;;  %1016 = vmatprep.subr.mxu0 %v1210_v26 }
  0xb1   :  { %1060 = vmatpush3.msra.mxu1 %v1180_v16  ;;  %1017 = vmatpush3.msra.mxu0 %v1210_v26 }
  0xb2   :  { %1061 = vmatprep.subr.mxu1 %v1182_v17  ;;  %1018 = vmatprep.subr.mxu0 %v1213_v27 }
  0xb3   :  { %1062 = vmatpush3.msra.mxu1 %v1182_v17  ;;  %1019 = vmatpush3.msra.mxu0 %v1213_v27  ;;  %v732_v27 = vld [vmem:[%s1569_s2 + $0x8] sm:$0xff] }
  0xb4   :  { %1063 = vmatprep.subr.mxu1 %v1197_v22  ;;  %1020 = vmatprep.subr.mxu0 %v1216_v28  ;;  %vm734_vm2 = vcmp.lt.f32.partialorder %v732_v27, 0.9 }
  0xb5   :  { %1064 = vmatpush3.msra.mxu1 %v1197_v22  ;;  %1021 = vmatpush3.msra.mxu0 %v1216_v28 }
  0xb6   :  { %1065 = vmatprep.subr.mxu1 %v1260_v46  ;;  %1022 = vmatprep.subr.mxu0 %v1225_v31 }
  0xb7   :  { %1066 = vmatpush3.msra.mxu1 %v1260_v46  ;;  %1023 = vmatpush3.msra.mxu0 %v1225_v31 }
  0xb8   :  { %1067 = vmatprep.subr.mxu1 %v1267_v48  ;;  %1024 = vmatprep.subr.mxu0 %v1242_v38 }
  0xb9   :  { %1068 = vmatpush3.msra.mxu1 %v1267_v48  ;;  %1025 = vmatpush3.msra.mxu0 %v1242_v38  ;;  %v731_v38 = vld [vmem:[%s1569_s2] sm:$0xff] }
  0xba   :  { %1069 = vmatprep.subr.mxu1 %v1269_v49  ;;  %1026 = vmatprep.subr.mxu0 %v1252_v42  ;;  %vm733_vm4 = vcmp.lt.f32.partialorder %v731_v38, 0.9 }
  0xbb   :  { %1070 = vmatpush3.msra.mxu1 %v1269_v49  ;;  %1027 = vmatpush3.msra.mxu0 %v1252_v42 }
  0xbc   :  { %1071 = vmatprep.subr.mxu1 %v1280_v54  ;;  %1028 = vmatprep.subr.mxu0 %v1264_v47 }
  0xbd   :  { %1072 = vmatpush3.msra.mxu1 %v1280_v54  ;;  %1029 = vmatpush3.msra.mxu0 %v1264_v47 }
  0xbe   :  { %1073 = vmatprep.subr.mxu1 %v1298_v61  ;;  %1030 = vmatprep.subr.mxu0 %v1292_v59 }
  0xbf   :  { %1074 = vmatpush3.msra.mxu1 %v1298_v61  ;;  %1031 = vmatpush3.msra.mxu0 %v1292_v59 }
  0xc0   :  { %1075 = vmatprep.subr.mxu1 %v1313_v4  ;;  %1032 = vmatprep.subr.mxu0 %v1307_v1 }
  0xc1   :  { %1076 = vmatpush3.msra.mxu1 %v1313_v4  ;;  %1033 = vmatpush3.msra.mxu0 %v1307_v1 }
  0xc2   :  { %1077 = vmatprep.subr.mxu1 %v1328_v13  ;;  %1034 = vmatprep.subr.mxu0 %v1322_v11 }
  0xc3   :  { %1078 = vmatpush3.msra.mxu1 %v1328_v13  ;;  %1035 = vmatpush3.msra.mxu0 %v1322_v11 }
  0xc4   :  { %1079 = vmatprep.subr.mxu1 %v1340_v35  ;;  %1036 = vmatprep.subr.mxu0 %v1334_v32 }
  0xc5   :  { %1080 = vmatpush3.msra.mxu1 %v1340_v35  ;;  %1037 = vmatpush3.msra.mxu0 %v1334_v32 }
  0xc6   :  { %1082 = vmatmul.mubr.msk.f32.vlgmr.msra.gmra.mxu1 %vm42_vm1, %v1115_v43  ;;  %1038 = vmatprep.subr.mxu0 %v1346_v39 }
  0xc7   :  { %1039 = vmatpush3.msra.mxu0 %v1346_v39 }
  0xc8   :  { %1040 = vmatprep.subr.mxu0 %v1356_v44 }
  0xc9   :  { %1041 = vmatpush3.msra.mxu0 %v1356_v44 }
  0xca   :  { %1042 = vmatprep.subr.mxu0 %v1366_v52 }
  0xcb   :  { %1043 = vmatpush3.msra.mxu0 %v1366_v52 }
  0xcc   :  { %1044 = vmatprep.subr.mxu0 %v1373_v58 }
  0xcd   :  { %1045 = vmatpush3.msra.mxu0 %v1373_v58 }
  0xce   :  { %1047 = vmatmul.mubr.msk.f32.vlgmr.msra.gmra.mxu0 %vm42_vm1, %v1115_v43 }
 0x143   :  { %v943_v7 = vpop.f32.mrf.mxu1 }
 0x145   :  { %v295_v14 = vpop.f32.mrf.mxu1 }
 0x14c   :  { %v908_v3 = vpop.f32.mrf.mxu0 }
 0x14d   :  { %v302_v15 = vadd.f32 %v943_v7, %v908_v3 }
 0x14e   :  { %v134_v8 = vpop.f32.mrf.mxu0 }
 0x14f   :  { %v296_v19 = vadd.f32 %v295_v14, %v134_v8 }
 0x164   :  { %v1013_v16 = vpop.f32.mrf.mxu1 }
 0x166   :  { %v501_v22 = vpop.f32.mrf.mxu1 }
 0x16d   :  { %v978_v9 = vpop.f32.mrf.mxu0 }
 0x16e   :  { %v413_v20 = vadd.f32 %v978_v9, %v302_v15 }
 0x16f   :  { %v405_v17 = vpop.f32.mrf.mxu0 }
 0x170   :  { %v406_v21 = vadd.f32 %v405_v17, %v296_v19  ;;  %v510_v23 = vadd.f32 %v1013_v16, %v413_v20 }
 0x172   :  { %v502_v28 = vadd.f32 %v501_v22, %v406_v21 }
 0x186   :  { %v1083_v24 = vpop.f32.mrf.mxu1 }
 0x188   :  { %v721_v42 = vpop.f32.mrf.mxu1 }
 0x18e   :  { %v1048_v25 = vpop.f32.mrf.mxu0 }
 0x18f   :  { %v635_v26 = vadd.f32 %v1048_v25, %v510_v23 }
 0x190   :  { %v628_v29 = vpop.f32.mrf.mxu0 }
 0x191   :  { %v728_v31 = vadd.f32 %v1083_v24, %v635_v26  ;;  %v629_v34 = vadd.f32 %v628_v29, %v502_v28 }
 0x193   :  { %v736_v46 = vmul.f32 1.1111112, %v728_v31  ;;  %v722_v47 = vadd.f32 %v721_v42, %v629_v34 }
 0x195   :  { %v738_v48 = vsel %vm734_vm2, %v736_v46, 0.0  ;;  %v735_v49 = vmul.f32 1.1111112, %v722_v47 }
 0x196   :  { %741 = vst.msk [vmem:[#allocation2 + $0x8] sm:$0xff] %vm739_vm3, %v738_v48 }
 0x197   :  { %v737_v53 = vsel %vm733_vm4, %v735_v49, 0.0 }
 0x198   :  { %740 = vst.msk [vmem:[#allocation2] sm:$0xff] %vm739_vm3, %v737_v53 }
 0x199   :  { %1102 = shalt.err (!%p1099_p4)
}
 0x19a   :  { %s1117_s2 = smov 128   ;;  %s1118_s26 = smov 8  }
 0x19b   :  { %753 = dma.vmem_to_hbm [thread:$0]  %s748_s24, 256, %s1570_s3, [#allocation3], %s1117_s2, %s1117_s2, %s1118_s26  }
 0x19c   :  { %1111 = dma.done.wait [#allocation3], 256  }
 0x19d   :  { %1112 = vsyncadd [#allocation3], 4294967040 }
 0x19e   :  { %757 = vsyncpa [#allocation3], 1 }

</bundles_post_ra>
